<compile_context>
chip_gen: v7x
topology: tpu7x:2x2x1
jax: 0.10.0
libtpu: 0.0.40
codegen_flags: <defaults>
</compile_context>

<pallas_src>
import math

import jax
import jax.numpy as jnp
from jax.experimental import pallas as pl
from jax.experimental.pallas import tpu as pltpu


def _round_up(x, m):
    return ((x + m - 1) // m) * m


# ---------------------------------------------------------------- kernels ---

def _sin_pos_emb_kernel(t_ref, tab_ref, o_ref):
    # t_ref:   (TILE_B, 1)  f32 timesteps
    # tab_ref: (2, dim)     f32: row 0 = freqs duplicated, row 1 = phase (0 | pi/2)
    # o_ref:   (TILE_B, dim)
    ang = t_ref[...] * tab_ref[0:1, :] + tab_ref[1:2, :]
    o_ref[...] = jnp.sin(ang).astype(o_ref.dtype)


def _sin_pos_emb_folded_kernel(t_ref, tab_ref, o_ref):
    # Lane-dense path for dim < 128: k = 128 // dim batch rows per output row.
    # t_ref:   (TILE_B, k)   f32
    # tab_ref: (k+1, 128)    rows 0..k-1 = selection*freqs, row k = phase
    # o_ref:   (TILE_B, 128)
    k = tab_ref.shape[0] - 1
    ang = jnp.dot(t_ref[...], tab_ref[0:k, :],
                  preferred_element_type=jnp.float32) + tab_ref[k:k + 1, :]
    o_ref[...] = jnp.sin(ang).astype(o_ref.dtype)


# ----------------------------------------------------------------- wrapper --

def _choose_tile_b(n_rows, width, out_bytes, *, vmem_budget=12 << 20,
                   max_tile=4096):
    """Batch tile (multiple of 8) sized against a conservative VMEM budget."""
    if n_rows <= 8:
        return n_rows
    # double-buffered t block (lane-padded to 128 lanes) + double-buffered out
    per_row = 2 * 128 * 4 + 2 * width * out_bytes
    tile = max(8, min(max_tile, vmem_budget // per_row))
    tile = (tile // 8) * 8
    if n_rows >= 16:
        # keep at least two grid steps so v7x's two TensorCores both get work
        tile = min(tile, _round_up(-(-n_rows // 2), 8))
    return max(8, min(tile, _round_up(n_rows, 8)))


def sinusoidal_pos_emb_pallas(t, dim, *, out_dtype=jnp.float32, max_tile_b=4096):
    """Pallas TPU forward of SinusoidalPosEmb: t (B,) -> (B, dim)."""
    assert dim % 2 == 0 and dim >= 4, "dim must be even with half_dim > 1"
    half_dim = dim // 2
    B = t.shape[0]
    t = t.astype(jnp.float32)

    # Hoisted constants: duplicated frequency row + phase row (cos = sin(x+pi/2)).
    scale = math.log(10000.0) / (half_dim - 1)
    freqs = jnp.exp(jnp.arange(half_dim, dtype=jnp.float32) * (-scale))
    freq_row = jnp.concatenate([freqs, freqs])                       # (dim,)
    phase_row = jnp.concatenate(
        [jnp.zeros((half_dim,), jnp.float32),
         jnp.full((half_dim,), jnp.pi / 2, dtype=jnp.float32)])      # (dim,)

    out_bytes = jnp.dtype(out_dtype).itemsize
    fold = (dim < 128) and (128 % dim == 0) and (B % (128 // dim) == 0)

    if fold:
        # Fold k batch rows into one lane-dense 128-wide output row.
        k = 128 // dim
        n_rows, width = B // k, 128
        lane = jnp.arange(width)
        sel = ((lane[None, :] // dim) == jnp.arange(k)[:, None]).astype(jnp.float32)
        sel = sel * jnp.tile(freq_row, (k,))[None, :]                # (k, 128)
        tab = jnp.concatenate(
            [sel, jnp.tile(phase_row, (k,))[None, :]], axis=0)       # (k+1, 128)
        t_in = t.reshape(n_rows, k)
        kernel, t_block_w = _sin_pos_emb_folded_kernel, k
    else:
        n_rows, width = B, dim
        tab = jnp.stack([freq_row, phase_row])                       # (2, dim)
        t_in = t.reshape(B, 1)
        kernel, t_block_w = _sin_pos_emb_kernel, 1
        # TODO(synk): dim < 128 with 128 % dim != 0 (or ragged B) falls back to
        # masked partial stores instead of the lane-dense fold.

    tile_b = _choose_tile_b(n_rows, width, out_bytes, max_tile=max_tile_b)
    grid = (pl.cdiv(n_rows, tile_b),)                # ragged last block is masked

    out = pl.pallas_call(
        kernel,
        out_shape=jax.ShapeDtypeStruct((n_rows, width), out_dtype),
        grid=grid,
        in_specs=[
            pl.BlockSpec((tile_b, t_block_w), lambda i: (i, 0)),  # t, tiled on batch
            pl.BlockSpec(tab.shape, lambda i: (0, 0)),            # table, resident
        ],
        out_specs=pl.BlockSpec((tile_b, width), lambda i: (i, 0)),
        compiler_params=pltpu.CompilerParams(
            dimension_semantics=("parallel",)),      # shard batch over v7x's 2 TCs
    )(t_in, tab)

    if fold:
        out = out.reshape(B, dim)  # row-major bit-identical un-fold
    return out


def sinusoidal_pos_emb_reference(t, dim):
    """Pure-JAX reference matching the PyTorch module."""
    half_dim = dim // 2
    scale = math.log(10000.0) / (half_dim - 1)
    freqs = jnp.exp(jnp.arange(half_dim, dtype=jnp.float32) * (-scale))
    ang = t[:, None].astype(jnp.float32) * freqs[None, :]
    return jnp.concatenate([jnp.sin(ang), jnp.cos(ang)], axis=-1)


def sinusoidal_pos_emb(t, dim, *, out_dtype=jnp.float32, min_pallas_batch=512):
    """Dispatcher: tiny batches skip Pallas (launch overhead > work; lets XLA fuse)."""
    if t.shape[0] < min_pallas_batch:
        return sinusoidal_pos_emb_reference(t, dim).astype(out_dtype)
    return sinusoidal_pos_emb_pallas(t, dim, out_dtype=out_dtype)


if __name__ == "__main__":
    key = jax.random.PRNGKey(0)
    B, dim = 8, 128
    t = jax.random.uniform(key, (B,), jnp.float32, 0.0, 1000.0)  # diffusion timesteps

    # Main (dim >= 128) Pallas path.
    out = sinusoidal_pos_emb_pallas(t, dim)
    jax.block_until_ready(out)
    ref = sinusoidal_pos_emb_reference(t, dim)
    assert out.shape == (B, dim)
    # cos(x)=sin(x+pi/2): with t up to 1e3 the phase add shifts the f32 argument
    # by a few ulps, so allow a slightly looser tolerance than bit-exactness.
    assert jnp.allclose(out, ref, atol=1e-3, rtol=1e-3), float(
        jnp.max(jnp.abs(out - ref)))

    # Lane-dense folded path (dim < 128).
    dim2 = 32
    out2 = sinusoidal_pos_emb_pallas(t, dim2)
    jax.block_until_ready(out2)
    ref2 = sinusoidal_pos_emb_reference(t, dim2)
    assert out2.shape == (B, dim2)
    assert jnp.allclose(out2, ref2, atol=1e-3, rtol=1e-3), float(
        jnp.max(jnp.abs(out2 - ref2)))

    # Dispatcher (tiny batch -> fused XLA path).
    out3 = sinusoidal_pos_emb(t, dim)
    jax.block_until_ready(out3)
    assert jnp.allclose(out3, ref, atol=1e-3, rtol=1e-3)

    print("KERNEL_OK")
</pallas_src>

<mosaic_0001>
module attributes {stable_mosaic.version = 11 : i64} {
  func.func @_sin_pos_emb_kernel(%arg0: i32, %arg1: memref<8x1xf32, #tpu.memory_space<vmem>>, %arg2: memref<2x128xf32, #tpu.memory_space<vmem>>, %arg3: memref<8x128xf32, #tpu.memory_space<vmem>>) attributes {dimension_semantics = [#tpu.dimension_semantics<parallel>], iteration_bounds = array<i64: 1>, scalar_prefetch = 0 : i64, scratch_operands = 0 : i64, tpu.core_type = #tpu.core_type<tc>, window_params = [{transform_indices = @transform_0, window_bounds = array<i64: 8, 1>}, {pipeline_mode = #tpu.pipeline_mode<synchronous>, transform_indices = @transform_1, window_bounds = array<i64: 2, 128>}, {transform_indices = @transform_2, window_bounds = array<i64: 8, 128>}]} {
    %c0 = arith.constant 0 : index
    %c0_0 = arith.constant 0 : index
    %0 = vector.load %arg1[%c0, %c0_0] : memref<8x1xf32, #tpu.memory_space<vmem>>, vector<8x1xf32>
    %c0_1 = arith.constant 0 : index
    %c0_2 = arith.constant 0 : index
    %1 = vector.load %arg2[%c0_1, %c0_2] : memref<2x128xf32, #tpu.memory_space<vmem>>, vector<1x128xf32>
    %2 = vector.broadcast %0 : vector<8x1xf32> to vector<8x128xf32>
    %3 = vector.broadcast %1 : vector<1x128xf32> to vector<8x128xf32>
    %4 = arith.mulf %2, %3 : vector<8x128xf32>
    %c1 = arith.constant 1 : index
    %c0_3 = arith.constant 0 : index
    %5 = vector.load %arg2[%c1, %c0_3] : memref<2x128xf32, #tpu.memory_space<vmem>>, vector<1x128xf32>
    %6 = vector.broadcast %5 : vector<1x128xf32> to vector<8x128xf32>
    %7 = arith.addf %4, %6 : vector<8x128xf32>
    %8 = math.sin %7 : vector<8x128xf32>
    %c0_4 = arith.constant 0 : index
    %c0_5 = arith.constant 0 : index
    %9 = vector.load %arg3[%c0_4, %c0_5] : memref<8x128xf32, #tpu.memory_space<vmem>>, vector<8x128xf32>
    tpu.vector_store %arg3[%c0_4, %c0_5], %8 {strides = array<i32>} : memref<8x128xf32, #tpu.memory_space<vmem>>, vector<8x128xf32>,
    return
  }
  func.func @transform_0(%arg0: i32) -> (i32, i32) {
    %c0_i32 = arith.constant 0 : i32
    %c0_i32_0 = arith.constant 0 : i32
    return %arg0, %c0_i32 : i32, i32
  }
  func.func @transform_1(%arg0: i32) -> (i32, i32) {
    %c0_i32 = arith.constant 0 : i32
    %c0_i32_0 = arith.constant 0 : i32
    %c0_i32_1 = arith.constant 0 : i32
    return %c0_i32, %c0_i32_0 : i32, i32
  }
  func.func @transform_2(%arg0: i32) -> (i32, i32) {
    %c0_i32 = arith.constant 0 : i32
    %c0_i32_0 = arith.constant 0 : i32
    return %arg0, %c0_i32 : i32, i32
  }
}

</mosaic_0001>

<bundles_post_ra>
// kernel: tpu_custom_call.1
= control target key start
LH: loop header
LB: loop body
LE: loop exit
PB: predicated region body
PF: predicated region fallthrough
CT: control target
= control target key end

     0   :  { %v196_v1 = vmov 0   ;;  %s261_s0 = inlined_call_operand.vmem [shape: f32[8,1], index: 0, kind: input, shape index: {}]   ;;  %s262_s1 = inlined_call_operand.vmem [shape: f32[2,128], index: 1, kind: input, shape index: {}]   ;;  %s263_s2 = inlined_call_operand.hbm [shape: f32[8,128], index: 2, kind: output, shape index: {}]  }
   0x1   :  { %v12_v0 = vld [vmem:[%s261_s0] sm:$0xff]  ;;  %167 = vset.pattern.permute.xlu0 %v196_v1 }
   0x2   :  { %16 = vperm.xlu0 %167, %v12_v0  }
   0x3   :  { %7 = vsyncpa [#allocation3], 0  ;;  %v149_v2 = vld [vmem:[%s262_s1] ss:$0 sm:$0xff]  ;;  %v150_v3 = vld [vmem:[%s262_s1 + $0x1] ss:$0 sm:$0xff] }
   0x4   :  { %v197_v18 = vmov 2102212464   ;;  %v198_v20 = vmov 920167782   ;;  %v199_v24 = vmov 1326507024  }
   0x5   :  { %v200_v26 = vmov 683565275   ;;  %v201_v28 = vmov 2475754826   ;;  %v202_v31 = vmov 2131351028  }
   0x6   :  { %s203_s0 = smov [#allocation2]  }
   0x7   :  { %s141_s1 = sshll.u32 %s203_s0, 4  ;;  %s142_s1 = int_to_ptr.vmem [resolvable:$true] %s141_s1 }
   0x8   :  { %s172_s15 = scalar_lea.vmem %s142_s1, 128  ;;  %p177_p1 = scmp.lt.s32.totalorder %s142_s1, %s142_s1 }
   0x9   :  { %p173_p0 = scmp.ne.s32.totalorder %s142_s1, %s172_s15  ;;  %p178_p2 = scmp.lt.s32.totalorder %s172_s15, %s172_s15 }
   0xb   :  { %p179_p3 = por %p178_p2, %p177_p1 }
   0xd   :  { %p180_p4 = pnand %p179_p3, %p173_p0 }
  0x81   :  { %v17_v4 = vpop.permute.xlu0 %16 }
  0x82   :  { %v23_v5 = vmul.f32 %v149_v2, %v17_v4 }
  0x84   :  { %v228_v6 = vadd.f32 %v150_v3, %v23_v5 }
  0x86   :  { %v33_v7 = vand.u32 2139095040, %v228_v6  ;;  %v30_v8 = vand.u32 2147483647, %v228_v6  ;;  %vm32_vm7 = vcmp.lt.s32.totalorder %v228_v6, 0  ;;  %vm122_vm12 = vweird.f32 %v228_v6 }
  0x88   :  { %v34_v9 = vshrl.u32 %v33_v7, 23  ;;  %v37_v11 = vand.u32 8388607, %v30_v8  ;;  %vm31_vm8 = vcmp.le.f32.partialorder %v30_v8, 0.7853982 }
  0x8a   :  { %v151_v10 = vadd.s32 4294967169, %v34_v9  ;;  %v38_v14 = vor.u32 8388608, %v37_v11 }
  0x8c   :  { %v40_v12 = vadd.s32 1, %v151_v10  ;;  %v78_v22 = vshll.u32 %v38_v14, 8 }
  0x8e   :  { %vm41_vm0 = vcmp.gt.s32.totalorder %v40_v12, 0 }
  0x8f   :  { %v42_v13 = vsel %vm41_vm0, %v40_v12, 0 }
  0x90   :  { %v44_v15 = vand.u32 31, %v42_v13  ;;  %v43_v16 = vshrl.u32 %v42_v13, 5 }
  0x92   :  { %v45_v17 = vsub.s32 32, %v44_v15  ;;  %v56_v19 = vshll.u32 %v197_v18, %v44_v15  ;;  %v59_v21 = vshll.u32 %v198_v20, %v44_v15  ;;  %v47_v27 = vshll.u32 %v200_v26, %v44_v15 }
  0x93   :  { %v50_v30 = vshll.u32 %v201_v28, %v44_v15  ;;  %v53_v33 = vshll.u32 %v202_v31, %v44_v15  ;;  %vm65_vm1 = vcmp.lt.s32.totalorder %v43_v16, 4  ;;  %vm62_vm2 = vcmp.lt.s32.totalorder %v43_v16, 1 }
  0x94   :  { %v57_v23 = vshrl.u32 %v198_v20, %v45_v17  ;;  %v60_v25 = vshrl.u32 %v199_v24, %v45_v17  ;;  %v48_v29 = vshrl.u32 %v201_v28, %v45_v17  ;;  %v51_v32 = vshrl.u32 %v202_v31, %v45_v17 }
  0x95   :  { %v54_v34 = vshrl.u32 %v197_v18, %v45_v17  ;;  %v46_v38 = vshrl.u32 %v200_v26, %v45_v17  ;;  %vm63_vm3 = vcmp.lt.s32.totalorder %v43_v16, 2  ;;  %vm64_vm4 = vcmp.lt.s32.totalorder %v43_v16, 3 }
  0x96   :  { %v58_v35 = vor.u32 %v57_v23, %v56_v19  ;;  %v61_v36 = vor.u32 %v60_v25, %v59_v21  ;;  %v49_v37 = vor.u32 %v48_v29, %v47_v27  ;;  %v52_v39 = vor.u32 %v51_v32, %v50_v30 }
  0x97   :  { %v55_v40 = vor.u32 %v54_v34, %v53_v33 }
  0x98   :  { %v71_v41 = vsel %vm65_vm1, %v58_v35, 920167782  ;;  %v75_v42 = vsel %vm65_vm1, %v61_v36, 1326507024  ;;  %v70_v44 = vsel %vm62_vm2, %v49_v37, %v52_v39  ;;  %v66_v47 = vsel %vm62_vm2, %v46_v38, %v49_v37 }
  0x99   :  { %v67_v43 = vsel %vm65_vm1, %v55_v40, 2102212464  ;;  %v72_v45 = vsel %vm64_vm4, %v55_v40, %v71_v41  ;;  %v74_v46 = vsel %vm62_vm2, %v52_v39, %v55_v40  ;;  %v76_v50 = vsel %vm64_vm4, %v58_v35, %v75_v42 }
  0x9a   :  { %v68_v48 = vsel %vm64_vm4, %v52_v39, %v67_v43  ;;  %v73_v49 = vsel %vm63_vm3, %v70_v44, %v72_v45  ;;  %v77_v51 = vsel %vm63_vm3, %v74_v46, %v76_v50 }
  0x9b   :  { %v234_v52 = vmul.u32.u64.low %v78_v22, %v73_v49  ;;  %v235_v53 = vmul.u32.u64.high %v78_v22, %v73_v49, %v234_v52  ;;  %v237_v54 = vmul.u32.u64.low %v78_v22, %v77_v51  ;;  %v238_v55 = vmul.u32.u64.high %v78_v22, %v77_v51, %v237_v54 }
  0x9c   :  { %v69_v56 = vsel %vm63_vm3, %v66_v47, %v68_v48 }
  0x9d   :  { %v88_v57 = vadd.s32 1, %v235_v53  ;;  %v85_v58 = vmul.u32 %v78_v22, %v69_v56  ;;  %vm87_vm5 = vc.u32 %v238_v55, %v234_v52  ;;  %v86_v7 = vadd.s32 %v234_v52, %v238_v55 }
  0x9f   :  { %v89_v59 = vsel %vm87_vm5, %v88_v57, %v235_v53 }
  0xa0   :  { %v90_v60 = vadd.s32 %v89_v59, %v85_v58 }
  0xa2   :  { %v91_v61 = vadd.s32 536870912, %v90_v60 }
  0xa4   :  { %v92_v62 = vshrl.u32 %v91_v61, 30 }
  0xa6   :  { %v93_v63 = vshll.u32 %v92_v62, 30  ;;  %v116_v20 = vsub.s32 4, %v92_v62 }
  0xa8   :  { %v94_v0 = vsub.s32 %v90_v60, %v93_v63  ;;  %v117_v23 = vsel %vm32_vm7, %v116_v20, %v92_v62 }
  0xa9   :  { %v119_v25 = vsel %vm31_vm8, 0, %v117_v23 }
  0xaa   :  { %v96_v1 = vsub.s32 0, %v94_v0  ;;  %v123_v26 = vadd.s32 3, %v119_v25 }
  0xac   :  { %v152_v2 = vmin.u32 %v96_v1, %v94_v0  ;;  %v124_v27 = vand.u32 3, %v123_v26 }
  0xae   :  { %v98_v3 = vclz %v152_v2  ;;  %vm129_vm9 = vcmp.eq.s32.totalorder %v124_v27, 2  ;;  %vm126_vm10 = vcmp.eq.s32.totalorder %v124_v27, 0  ;;  %vm125_vm11 = vcmp.lt.s32.totalorder %v124_v27, 2 }
  0xb0   :  { %v153_v4 = vadd.s32 4294967294, %v98_v3 }
  0xb2   :  { %vm154_vm6 = vcmp.lt.s32.totalorder %v153_v4, 0 }
  0xb3   :  { %v101_v5 = vsel %vm154_vm6, 0, %v153_v4 }
  0xb4   :  { %v102_v9 = vsub.s32 32, %v101_v5  ;;  %v106_v10 = vsub.s32 4294967266, %v101_v5  ;;  %v103_v11 = vshll.u32 %v94_v0, %v101_v5 }
  0xb6   :  { %v104_v12 = vshrl.u32 %v86_v7, %v102_v9  ;;  %v107_v13 = vadd.s32 127, %v106_v10 }
  0xb8   :  { %v105_v14 = vor.u32 %v104_v12, %v103_v11  ;;  %v108_v15 = vshll.u32 %v107_v13, 23 }
  0xba   :  { %v109_v16 = vor.u32 4788187, %v108_v15  ;;  %v112_v18 = vcvt.s32.f32 %v105_v14 }
  0xbc   :  { %v110_v17 = vand.u32 2147483647, %v109_v16 }
  0xbe   :  { %v113_v19 = vmul.f32 %v112_v18, %v110_v17 }
  0xc0   :  { %v114_v21 = vxor.u32 2147483648, %v113_v19 }
  0xc2   :  { %v115_v22 = vsel %vm32_vm7, %v114_v21, %v113_v19 }
  0xc3   :  { %v118_v24 = vsel %vm31_vm8, %v228_v6, %v115_v22 }
  0xc4   :  { %168 = vcosq.f32 %v118_v24 }
  0xc5   :  { %170 = vsinq.f32 %v118_v24 }
  0xce   :  { %v169_v28 = vpop.eup %168 }
  0xcf   :  { %v171_v29 = vpop.eup %170  ;;  %v130_v30 = vxor.u32 2147483648, %v169_v28 }
  0xd0   :  { %v127_v31 = vxor.u32 2147483648, %v171_v29 }
  0xd1   :  { %v131_v32 = vsel %vm129_vm9, %v130_v30, %v171_v29 }
  0xd2   :  { %v128_v8 = vsel %vm126_vm10, %v169_v28, %v127_v31 }
  0xd3   :  { %v132_v33 = vsel %vm125_vm11, %v128_v8, %v131_v32 }
  0xd4   :  { %v133_v34 = vsel %vm122_vm12, nan, %v132_v33 }
  0xd5   :  { %134 = vst [vmem:[#allocation2] sm:$0xff] %v133_v34 }
  0xd6   :  { %183 = shalt.err (!%p180_p4)
}
  0xd7   :  { %s184_s18 = scalar_lea.hbm %s263_s2, 128 }
  0xd8   :  { %p185_p5 = scmp.ne.s32.totalorder %s263_s2, %s184_s18  ;;  %p188_p6 = scmp.lt.u32.totalorder %s184_s18, %s263_s2 }
  0xda   :  { %p190_p7 = pnand %p188_p6, %p185_p5 }
  0xdc   :  { %193 = shalt.err (!%p190_p7)
}
  0xdd   :  { %144 = dma.vmem_to_hbm [thread:$0]  %s142_s1, 128, %s263_s2, [#allocation3]  }
  0xde   :  { %194 = dma.done.wait [#allocation3], 128  }
  0xdf   :  { %195 = vsyncadd [#allocation3], 4294967168 }
  0xe0   :  { %148 = vsyncpa [#allocation3], 1 }

</bundles_post_ra>
